<compile_context>
chip_gen: v7x
topology: tpu7x:2x2x1
jax: 0.10.0
libtpu: 0.0.40
codegen_flags: <defaults>
</compile_context>

<pallas_src>
import functools

import numpy as np
import jax
import jax.numpy as jnp
from jax import lax
from jax.experimental import pallas as pl
from jax.experimental.pallas import tpu as pltpu


# ----------------------------------------------------------------------------
# helpers (plain-JAX / numpy glue)
# ----------------------------------------------------------------------------
def get_nf(res, fmaps_base, fmaps_max):
    return min(fmaps_base // res, fmaps_max)


def upsample1d_matrix(h, filter_kernel):
    """Linear operator equivalent to 1-D upfirdn (up=2, pad=(2,1), per-axis gain=2)."""
    f = np.asarray(filter_kernel, np.float64)
    f = f / f.sum() * 2.0          # per-axis share of the 2-D gain of up**2 = 4
    g = f[::-1]                    # upfirdn2d flips the filter (symmetric here anyway)
    u = np.zeros((2 * h, h), np.float64)
    for o in range(2 * h):
        for k in range(len(f)):
            m = o + k - 2          # index into the zero-stuffed signal
            if 0 <= m < 2 * h and m % 2 == 0:
                u[o, m // 2] += g[k]
    return u


def upsample2x_pixel_T_matrix(h, filter_kernel):
    """(h*h, 4*h*h) operator: (C, HW) @ U_T upsamples row-major square images 2x."""
    # TODO(synk): for h > 32 replace the dense kron operator with separable 1-D
    # upsampling ((C*H, W) @ Uw^T, transpose, then along H) — the dense form is
    # O(HW^2) and would exceed v7x's 64 MiB VMEM at higher resolutions; at the
    # small resolutions used here it is a few KiB and a single MXU matmul.
    assert h <= 32, "dense kron upsample operator only intended for small resolutions"
    u = upsample1d_matrix(h, filter_kernel)
    return jnp.asarray(np.kron(u, u).T, jnp.float32)


# ----------------------------------------------------------------------------
# per-layer prep (tiny, done in f32 outside the kernel)
# ----------------------------------------------------------------------------
def _affine_style(wp_l, p):
    # DenseLayer(init_bias=1.0, linear activation) with wscale / lr_mul.
    return wp_l @ p['swT'] * p['style_wscale'] + p['sb'][None, :] * p['style_bscale']


def _fold_weight(style, p, demodulate, eps):
    # Exactly the torch ModulatedConv math (wscale applied before modulation and
    # inside the demod denominator, so the eps weighting matches torch).
    w = p['w'] * p['conv_wscale']                    # (c_out, c_in)
    wm = w[None, :, :] * style[:, None, :]           # (n, c_out, c_in)
    if demodulate:
        wm = wm * lax.rsqrt(jnp.sum(wm * wm, axis=-1, keepdims=True) + eps)
    return wm


def _block_diag(w, num_steps, n_pack):
    """(num_steps*n_pack, c_out, c_in) -> (num_steps, n_pack*c_out, n_pack*c_in)."""
    co, ci = w.shape[-2], w.shape[-1]
    w = w.reshape(num_steps, n_pack, co, ci)
    eye = jnp.eye(n_pack, dtype=w.dtype)
    bd = jnp.einsum('spoc,pq->spoqc', w, eye)        # zero off-diagonal blocks
    return bd.reshape(num_steps, n_pack * co, n_pack * ci)


def _bias_noise_map(p, hw_out):
    # Lane-dense (c_out, hw_out) additive map: bias (+ const spatial noise).
    b = (p['bias'] * p['bias_bscale'])[:, None]      # (c_out, 1)
    if p.get('noise') is not None:
        return b + p['noise_strength'] * p['noise'][None, :]
    return jnp.broadcast_to(b, (b.shape[0], hw_out))


# ----------------------------------------------------------------------------
# fused Pallas kernel (one grid step per pack of n_pack batch samples)
# ----------------------------------------------------------------------------
def _make_fused_kernel(n_blocks, n_pack, c0, img_c, conv_clamp, act_gain, final_tanh):
    bf16 = jnp.bfloat16

    def lrelu(v):
        v = jnp.where(v >= 0.0, v, 0.2 * v) * act_gain   # runtime_gain = 1
        if conv_clamp is not None:
            v = jnp.clip(v, -conv_clamp, conv_clamp)
        return v

    def kernel(*refs):
        x_ref, out_ref = refs[0], refs[-1]
        blk = refs[1:-1]

        feat = x_ref[...]            # (P*c0, hw0) bf16 — stays VMEM/vreg resident

        # cur_image = x[:, :3] (rgb_init_res_out=False path): static sublane
        # slices of the resident feat block — no extra HBM input / DMA.
        cur_img = jnp.concatenate(
            [feat[p * c0: p * c0 + img_c, :] for p in range(n_pack)],
            axis=0).astype(jnp.float32)                    # (P*img_c, hw0) f32

        for b in range(n_blocks):    # unrolled at trace time
            (wup_ref, uT_ref, addup_ref,
             w2_ref, add2_ref, wrgb_ref, brgb_ref) = blk[7 * b: 7 * b + 7]

            # layer 2b+1: modulated 1x1 conv (block-diag packed folded weights)
            z = jnp.dot(wup_ref[...], feat, preferred_element_type=jnp.float32)
            rows_z = z.shape[0]                            # P*c_mid (static)

            # ONE fused upfirdn 2x upsample for BOTH features and current image
            pre = jnp.concatenate([z, cur_img], axis=0).astype(bf16)
            up = jnp.dot(pre, uT_ref[...], preferred_element_type=jnp.float32)
            z_up, img_up = up[:rows_z, :], up[rows_z:, :]

            # +noise*strength +bias, lrelu (+clamp)
            z_up = lrelu(z_up + addup_ref[...])

            # layer 2b+2: modulated 1x1 conv
            f2 = jnp.dot(w2_ref[...], z_up.astype(bf16),
                         preferred_element_type=jnp.float32)
            f2 = lrelu(f2 + add2_ref[...])
            feat = f2.astype(bf16)

            # output (ToRGB, demodulate=False, linear)
            y = jnp.dot(wrgb_ref[...], feat, preferred_element_type=jnp.float32)
            y = y + brgb_ref[...]
            if conv_clamp is not None:
                y = jnp.clip(y, -conv_clamp, conv_clamp)

            # cur_image = y + upfirdn2d.upsample2d(cur_image, filter)
            cur_img = y + img_up

        if final_tanh:
            cur_img = jnp.tanh(cur_img)        # EUP slot is otherwise idle here
        out_ref[...] = cur_img                 # (P*img_c, hw_final) f32, lane-dense

    return kernel


def post_neural_renderer_forward_pallas(cfg, params, x_nchw, wp, lod=0.0,
                                        max_pack=8):
    # TODO(synk): progressive-growing LOD blending (F.interpolate nearest),
    # rgb_init_res_out=True and nerf_out paths are not implemented.
    assert lod == 0.0
    n, c0, h0, w0 = x_nchw.shape
    assert h0 == w0 == cfg['init_res'] and c0 >= 3
    hw0 = h0 * w0
    init_log2 = int(np.log2(cfg['init_res']))
    final_log2 = int(np.log2(cfg['resolution']))
    n_blocks = final_log2 - init_log2
    assert n_blocks >= 1
    eps = cfg['eps']
    img_c = cfg['image_channels']

    # ---- batch packing: n_pack samples per grid step (block-diag weights). ----
    # On v7x callers may prefer max_pack = ceil(n/2) so >= 2 "parallel" grid
    # steps keep both TensorCores busy; on v5e/v6e (1 TC) pack maximally.
    n_pack = max(1, min(n, max_pack))
    num_steps = -(-n // n_pack)                  # cdiv
    n_pad = num_steps * n_pack
    if n_pad != n:
        x_nchw = jnp.pad(x_nchw, ((0, n_pad - n), (0, 0), (0, 0), (0, 0)))
        wp = jnp.pad(wp, ((0, n_pad - n), (0, 0), (0, 0)))

    # NCHW -> packed channels-first (num_steps, n_pack*C, H*W), bf16 MXU operand.
    x_pm = (x_nchw.reshape(n_pad, c0, hw0)
                  .reshape(num_steps, n_pack * c0, hw0)
                  .astype(jnp.bfloat16))

    results = {}
    inputs = [x_pm]
    in_specs = [pl.BlockSpec((None, n_pack * c0, hw0), lambda i: (i, 0, 0))]
    flops = 0

    for b in range(1, n_blocks + 1):
        res = cfg['init_res'] * (2 ** b)
        hw_in, hw_out = (res // 2) ** 2, res * res
        lp_up = params[f'layer{2 * b - 1}']
        lp_mid = params[f'layer{2 * b}']
        lp_rgb = params[f'output{b}']
        c_in = lp_up['w'].shape[1]
        c_mid = lp_up['w'].shape[0]

        # style affines (tiny f32 matmuls, computed outside the kernel)
        s_up = _affine_style(wp[:, 2 * b - 1], lp_up)
        s_mid = _affine_style(wp[:, 2 * b], lp_mid)
        s_rgb = _affine_style(wp[:, 2 * b + 1], lp_rgb)
        results[f'style{2 * b - 1}'] = s_up[:n]
        results[f'style{2 * b}'] = s_mid[:n]
        results[f'output_style{b}'] = s_rgb[:n]

        # fold modulation (+demod) into per-sample 1x1 weights, then pack the
        # n_pack samples of each grid step into a block-diagonal matrix.
        w_up = _block_diag(_fold_weight(s_up, lp_up, cfg['demodulate'], eps),
                           num_steps, n_pack).astype(jnp.bfloat16)
        w_mid = _block_diag(_fold_weight(s_mid, lp_mid, cfg['demodulate'], eps),
                            num_steps, n_pack).astype(jnp.bfloat16)
        w_rgb = _block_diag(_fold_weight(s_rgb, lp_rgb, False, eps),
                            num_steps, n_pack).astype(jnp.bfloat16)

        uT = params[f'up_T_{res // 2}'].astype(jnp.bfloat16)     # (hw_in, hw_out)
        add_up = jnp.tile(_bias_noise_map(lp_up, hw_out), (n_pack, 1))
        add_mid = jnp.tile(_bias_noise_map(lp_mid, hw_out), (n_pack, 1))
        add_rgb = jnp.tile(_bias_noise_map(lp_rgb, hw_out), (n_pack, 1))

        inputs += [w_up, uT, add_up, w_mid, add_mid, w_rgb, add_rgb]
        # TODO(synk): at higher resolutions mark the batch-invariant operands
        # (uT / add_*) with pipeline_mode=pl.Buffered(1) (or stage them once
        # into scratch) to halve their VMEM footprint; negligible at these sizes.
        in_specs += [
            pl.BlockSpec((None, n_pack * c_mid, n_pack * c_in), lambda i: (i, 0, 0)),
            pl.BlockSpec((hw_in, hw_out), lambda i: (0, 0)),
            pl.BlockSpec((n_pack * c_mid, hw_out), lambda i: (0, 0)),
            pl.BlockSpec((None, n_pack * c_mid, n_pack * c_mid), lambda i: (i, 0, 0)),
            pl.BlockSpec((n_pack * c_mid, hw_out), lambda i: (0, 0)),
            pl.BlockSpec((None, n_pack * img_c, n_pack * c_mid), lambda i: (i, 0, 0)),
            pl.BlockSpec((n_pack * img_c, hw_out), lambda i: (0, 0)),
        ]

        flops += 2 * num_steps * (
            (n_pack * c_mid) * (n_pack * c_in) * hw_in             # w_up @ feat
            + (n_pack * (c_mid + img_c)) * hw_in * hw_out          # [z; img] @ uT
            + (n_pack * c_mid) * (n_pack * c_mid) * hw_out         # w_mid @ z_up
            + (n_pack * img_c) * (n_pack * c_mid) * hw_out)        # w_rgb @ feat

    hw_final = cfg['resolution'] ** 2
    clamp = float(cfg['conv_clamp']) if cfg['conv_clamp'] is not None else None
    final_tanh = bool(cfg['final_tanh'])
    kernel = _make_fused_kernel(n_blocks, n_pack, c0, img_c, clamp,
                                float(np.sqrt(2.0)), final_tanh)

    out_shape = jax.ShapeDtypeStruct((num_steps, n_pack * img_c, hw_final),
                                     jnp.float32)
    bytes_accessed = sum(int(np.prod(a.shape)) * a.dtype.itemsize for a in inputs)
    bytes_accessed += int(np.prod(out_shape.shape)) * 4
    transcendentals = n_pad * img_c * hw_final if final_tanh else 0

    image_flat = pl.pallas_call(
        kernel,
        out_shape=out_shape,
        grid_spec=pltpu.PrefetchScalarGridSpec(
            num_scalar_prefetch=0,
            grid=(num_steps,),
            in_specs=in_specs,
            out_specs=pl.BlockSpec((None, n_pack * img_c, hw_final),
                                   lambda i: (i, 0, 0))),
        compiler_params=pltpu.CompilerParams(
            dimension_semantics=("parallel",)),    # fat steps across TCs on v7x
        cost_estimate=pl.CostEstimate(flops=int(flops),
                                      transcendentals=int(transcendentals),
                                      bytes_accessed=int(bytes_accessed)),
    )(*inputs)

    # (num_steps, P*img_c, hw) -> (n, img_c, H, W); tanh already applied in-kernel.
    image = (image_flat.reshape(n_pad, img_c, hw_final)[:n]
             .reshape(n, img_c, cfg['resolution'], cfg['resolution']))
    results['image'] = image
    return results


# ----------------------------------------------------------------------------
# pure-JAX f32 reference (same math, used only for validation)
# ----------------------------------------------------------------------------
def post_neural_renderer_forward_ref(cfg, params, x_nchw, wp):
    n, c0, h0, w0 = x_nchw.shape
    eps, clamp, gain = cfg['eps'], cfg['conv_clamp'], float(np.sqrt(2.0))
    init_log2 = int(np.log2(cfg['init_res']))
    final_log2 = int(np.log2(cfg['resolution']))

    feat = x_nchw.reshape(n, c0, h0 * w0).astype(jnp.float32)
    cur_img = feat[:, :3, :]
    results = {}

    def layer(f, wp_l, p, demod, act, upT, noise):
        style = wp_l @ p['swT'] * p['style_wscale'] + p['sb'][None, :] * p['style_bscale']
        w = p['w'] * p['conv_wscale']
        wm = w[None] * style[:, None, :]
        if demod:
            wm = wm * lax.rsqrt(jnp.sum(wm * wm, axis=-1, keepdims=True) + eps)
        y = jnp.einsum('noc,ncp->nop', wm, f)
        if upT is not None:
            y = jnp.einsum('nop,pq->noq', y, upT)
        if noise is not None:
            y = y + p['noise_strength'] * noise[None, None, :]
        y = y + (p['bias'] * p['bias_bscale'])[None, :, None]
        if act == 'lrelu':
            y = jnp.where(y >= 0.0, y, 0.2 * y) * gain
        if clamp is not None:
            y = jnp.clip(y, -clamp, clamp)
        return y, style

    for b in range(1, final_log2 - init_log2 + 1):
        res = cfg['init_res'] * (2 ** b)
        uT = params[f'up_T_{res // 2}']
        lp = params[f'layer{2 * b - 1}']
        feat, s = layer(feat, wp[:, 2 * b - 1], lp, cfg['demodulate'], 'lrelu', uT, lp['noise'])
        results[f'style{2 * b - 1}'] = s
        lp = params[f'layer{2 * b}']
        feat, s = layer(feat, wp[:, 2 * b], lp, cfg['demodulate'], 'lrelu', None, lp['noise'])
        results[f'style{2 * b}'] = s
        op = params[f'output{b}']
        y, s = layer(feat, wp[:, 2 * b + 1], op, False, 'linear', None, None)
        results[f'output_style{b}'] = s
        cur_img = y + jnp.einsum('ncp,pq->ncq', cur_img, uT)

    image = cur_img.reshape(n, 3, cfg['resolution'], cfg['resolution'])
    if cfg['final_tanh']:
        image = jnp.tanh(image)
    results['image'] = image
    return results


# ----------------------------------------------------------------------------
# parameters (deterministic synthetic init following the module's __init__)
# ----------------------------------------------------------------------------
def init_modconv_params(key, w_dim, c_in, c_out, cfg):
    use_wscale, gain, lr_mul = cfg['use_wscale'], cfg['wscale_gain'], cfg['lr_mul']
    k1, k2 = jax.random.split(key)
    dense_w = jax.random.normal(k1, (c_in, w_dim), jnp.float32)   # style affine weight
    conv_w = jax.random.normal(k2, (c_out, c_in), jnp.float32)    # 1x1 conv weight
    dense_wscale = gain / np.sqrt(w_dim)
    conv_wscale = gain / np.sqrt(c_in)                            # fan_in = c_in*1*1
    if use_wscale:
        dense_w = dense_w / lr_mul
        conv_w = conv_w / lr_mul
        style_wscale = dense_wscale * lr_mul
        conv_wscale_eff = conv_wscale * lr_mul
    else:
        dense_w = dense_w * dense_wscale / lr_mul
        conv_w = conv_w * conv_wscale / lr_mul
        style_wscale = lr_mul
        conv_wscale_eff = lr_mul
    return dict(
        swT=dense_w.T,                                            # (w_dim, c_in)
        sb=jnp.full((c_in,), 1.0 / lr_mul, jnp.float32),          # init_bias=1.0
        w=conv_w,                                                 # (c_out, c_in)
        bias=0.05 * jnp.arange(c_out, dtype=jnp.float32),
        style_wscale=float(style_wscale),
        style_bscale=float(lr_mul),
        conv_wscale=float(conv_wscale_eff),
        bias_bscale=float(lr_mul),
    )


def build_params(key, cfg):
    init_log2 = int(np.log2(cfg['init_res']))
    final_log2 = int(np.log2(cfg['resolution']))
    nf = lambda r: get_nf(r, cfg['fmaps_base'], cfg['fmaps_max'])
    use_noise = cfg['noise_type'].lower() != 'none'
    n_blocks = final_log2 - init_log2
    keys = iter(jax.random.split(key, 5 * n_blocks + 2))
    params = {}
    for res_log2 in range(init_log2 + 1, final_log2 + 1):
        res = 2 ** res_log2
        in_c, out_c = nf(res // 2), nf(res)
        b = res_log2 - init_log2
        # layer 2b-1: modconv with 2x upsample
        lp = init_modconv_params(next(keys), cfg['w_dim'], in_c, out_c, cfg)
        lp['noise'] = (jax.random.normal(next(keys), (res * res,), jnp.float32)
                       if use_noise else None)
        lp['noise_strength'] = 0.1 if use_noise else 0.0  # torch init=0; nonzero to exercise path
        params[f'layer{2 * b - 1}'] = lp
        # layer 2b: modconv
        lp = init_modconv_params(next(keys), cfg['w_dim'], out_c, out_c, cfg)
        lp['noise'] = (jax.random.normal(next(keys), (res * res,), jnp.float32)
                       if use_noise else None)
        lp['noise_strength'] = 0.1 if use_noise else 0.0
        params[f'layer{2 * b}'] = lp
        # output b: ToRGB (demodulate=False, noise='none', linear)
        op = init_modconv_params(next(keys), cfg['w_dim'], out_c,
                                 cfg['image_channels'], cfg)
        op['noise'] = None
        op['noise_strength'] = 0.0
        params[f'output{b}'] = op
        # shared pixel-upsample operator (same filter/pad/gain as upfirdn2d.upsample2d)
        params[f'up_T_{res // 2}'] = upsample2x_pixel_T_matrix(res // 2,
                                                               cfg['filter_kernel'])
    return params


# ----------------------------------------------------------------------------
if __name__ == "__main__":
    cfg = dict(
        resolution=16, init_res=8, w_dim=32, image_channels=3,
        final_tanh=False, demodulate=True, use_wscale=True, wscale_gain=1.0,
        lr_mul=1.0, noise_type='spatial', fmaps_base=256, fmaps_max=32,
        filter_kernel=(1, 3, 3, 1), conv_clamp=256.0, eps=1e-8,
        rgb_init_res_out=False)

    init_log2 = int(np.log2(cfg['init_res']))
    final_log2 = int(np.log2(cfg['resolution']))
    num_layers = (final_log2 - init_log2 + 1) * 2   # = 4

    key = jax.random.PRNGKey(0)
    k_params, k_x, k_w = jax.random.split(key, 3)
    params = build_params(k_params, cfg)

    n = 2
    c0 = get_nf(cfg['init_res'], cfg['fmaps_base'], cfg['fmaps_max'])   # 32
    x = jax.random.normal(k_x, (n, c0, cfg['init_res'], cfg['init_res']), jnp.float32)
    wp = jax.random.normal(k_w, (n, num_layers, cfg['w_dim']), jnp.float32)

    fwd = jax.jit(functools.partial(post_neural_renderer_forward_pallas, cfg, params))
    results = fwd(x, wp)
    image = jax.block_until_ready(results['image'])
    assert image.shape == (n, cfg['image_channels'], cfg['resolution'], cfg['resolution'])

    ref = post_neural_renderer_forward_ref(cfg, params, x, wp)
    np.testing.assert_allclose(np.asarray(image), np.asarray(ref['image']),
                               rtol=0.1, atol=0.1)
    for kname in ('style1', 'style2', 'output_style1'):
        np.testing.assert_allclose(np.asarray(results[kname]), np.asarray(ref[kname]),
                                   rtol=0.1, atol=0.1)

    print("KERNEL_OK")
</pallas_src>

<mosaic_0001>
module attributes {stable_mosaic.version = 11 : i64} {
  func.func @kernel(%arg0: i32, %arg1: memref<1x64x64xbf16, #tpu.memory_space<vmem>>, %arg2: memref<1x32x64xbf16, #tpu.memory_space<vmem>>, %arg3: memref<64x256xbf16, #tpu.memory_space<vmem>>, %arg4: memref<32x256xf32, #tpu.memory_space<vmem>>, %arg5: memref<1x32x32xbf16, #tpu.memory_space<vmem>>, %arg6: memref<32x256xf32, #tpu.memory_space<vmem>>, %arg7: memref<1x6x32xbf16, #tpu.memory_space<vmem>>, %arg8: memref<6x256xf32, #tpu.memory_space<vmem>>, %arg9: memref<1x6x256xf32, #tpu.memory_space<vmem>>) attributes {dimension_semantics = [#tpu.dimension_semantics<parallel>], iteration_bounds = array<i64: 1>, scalar_prefetch = 0 : i64, scratch_operands = 0 : i64, tpu.core_type = #tpu.core_type<tc>, window_params = [{transform_indices = @transform_0, window_bounds = array<i64: 1, 64, 64>}, {transform_indices = @transform_1, window_bounds = array<i64: 1, 32, 64>}, {pipeline_mode = #tpu.pipeline_mode<synchronous>, transform_indices = @transform_2, window_bounds = array<i64: 64, 256>}, {pipeline_mode = #tpu.pipeline_mode<synchronous>, transform_indices = @transform_3, window_bounds = array<i64: 32, 256>}, {transform_indices = @transform_4, window_bounds = array<i64: 1, 32, 32>}, {pipeline_mode = #tpu.pipeline_mode<synchronous>, transform_indices = @transform_5, window_bounds = array<i64: 32, 256>}, {transform_indices = @transform_6, window_bounds = array<i64: 1, 6, 32>}, {pipeline_mode = #tpu.pipeline_mode<synchronous>, transform_indices = @transform_7, window_bounds = array<i64: 6, 256>}, {transform_indices = @transform_8, window_bounds = array<i64: 1, 6, 256>}]} {
    %c0 = arith.constant 0 : index
    %c0_0 = arith.constant 0 : index
    %c0_1 = arith.constant 0 : index
    %0 = vector.load %arg1[%c0, %c0_0, %c0_1] : memref<1x64x64xbf16, #tpu.memory_space<vmem>>, vector<1x64x64xbf16>
    %1 = vector.shape_cast %0 : vector<1x64x64xbf16> to vector<64x64xbf16>
    %2 = vector.extract_strided_slice %1 {offsets = [0, 0], sizes = [3, 64], strides = [1, 1]} : vector<64x64xbf16> to vector<3x64xbf16>
    %3 = vector.extract_strided_slice %1 {offsets = [32, 0], sizes = [3, 64], strides = [1, 1]} : vector<64x64xbf16> to vector<3x64xbf16>
    %4 = tpu.concatenate %2, %3 in 0 : vector<3x64xbf16>, vector<3x64xbf16> -> vector<6x64xbf16>
    %5 = arith.extf %4 : vector<6x64xbf16> to vector<6x64xf32>
    %c0_2 = arith.constant 0 : index
    %c0_3 = arith.constant 0 : index
    %c0_4 = arith.constant 0 : index
    %6 = vector.load %arg2[%c0_2, %c0_3, %c0_4] : memref<1x32x64xbf16, #tpu.memory_space<vmem>>, vector<1x32x64xbf16>
    %7 = vector.shape_cast %6 : vector<1x32x64xbf16> to vector<32x64xbf16>
    %cst = arith.constant dense<0.000000e+00> : vector<32x64xf32>
    %8 = tpu.matmul %7, %1, %cst {dimension_numbers = #tpu.dot_dimension_numbers<[1], [0], [0], [1], [0, 0, 1, 1], [], []>} : vector<32x64xbf16>, vector<64x64xbf16>, vector<32x64xf32> -> vector<32x64xf32>
    %9 = tpu.concatenate %8, %5 in 0 : vector<32x64xf32>, vector<6x64xf32> -> vector<38x64xf32>
    %10 = arith.truncf %9 : vector<38x64xf32> to vector<38x64xbf16>
    %c0_5 = arith.constant 0 : index
    %c0_6 = arith.constant 0 : index
    %11 = vector.load %arg3[%c0_5, %c0_6] : memref<64x256xbf16, #tpu.memory_space<vmem>>, vector<64x256xbf16>
    %cst_7 = arith.constant dense<0.000000e+00> : vector<38x256xf32>
    %12 = tpu.matmul %10, %11, %cst_7 {dimension_numbers = #tpu.dot_dimension_numbers<[1], [0], [0], [1], [0, 0, 1, 1], [], []>} : vector<38x64xbf16>, vector<64x256xbf16>, vector<38x256xf32> -> vector<38x256xf32>
    %13 = vector.extract_strided_slice %12 {offsets = [0, 0], sizes = [32, 256], strides = [1, 1]} : vector<38x256xf32> to vector<32x256xf32>
    %14 = vector.extract_strided_slice %12 {offsets = [32, 0], sizes = [6, 256], strides = [1, 1]} : vector<38x256xf32> to vector<6x256xf32>
    %c0_8 = arith.constant 0 : index
    %c0_9 = arith.constant 0 : index
    %15 = vector.load %arg4[%c0_8, %c0_9] : memref<32x256xf32, #tpu.memory_space<vmem>>, vector<32x256xf32>
    %16 = arith.addf %13, %15 : vector<32x256xf32>
    %cst_10 = arith.constant 0.000000e+00 : f32
    %17 = vector.broadcast %cst_10 : f32 to vector<32x256xf32>
    %18 = arith.cmpf oge, %16, %17 : vector<32x256xf32>
    %cst_11 = arith.constant 2.000000e-01 : f32
    %19 = vector.broadcast %cst_11 : f32 to vector<32x256xf32>
    %20 = arith.mulf %19, %16 : vector<32x256xf32>
    %21 = arith.select %18, %16, %20 : vector<32x256xi1>, vector<32x256xf32>
    %cst_12 = arith.constant 1.41421354 : f32
    %22 = vector.broadcast %cst_12 : f32 to vector<32x256xf32>
    %23 = arith.mulf %21, %22 : vector<32x256xf32>
    %cst_13 = arith.constant -2.560000e+02 : f32
    %cst_14 = arith.constant 2.560000e+02 : f32
    %24 = vector.broadcast %cst_13 : f32 to vector<32x256xf32>
    %25 = arith.maximumf %24, %23 : vector<32x256xf32>
    %26 = vector.broadcast %cst_14 : f32 to vector<32x256xf32>
    %27 = arith.minimumf %26, %25 : vector<32x256xf32>
    %c0_15 = arith.constant 0 : index
    %c0_16 = arith.constant 0 : index
    %c0_17 = arith.constant 0 : index
    %28 = vector.load %arg5[%c0_15, %c0_16, %c0_17] : memref<1x32x32xbf16, #tpu.memory_space<vmem>>, vector<1x32x32xbf16>
    %29 = vector.shape_cast %28 : vector<1x32x32xbf16> to vector<32x32xbf16>
    %30 = arith.truncf %27 : vector<32x256xf32> to vector<32x256xbf16>
    %cst_18 = arith.constant dense<0.000000e+00> : vector<32x256xf32>
    %31 = tpu.matmul %29, %30, %cst_18 {dimension_numbers = #tpu.dot_dimension_numbers<[1], [0], [0], [1], [0, 0, 1, 1], [], []>} : vector<32x32xbf16>, vector<32x256xbf16>, vector<32x256xf32> -> vector<32x256xf32>
    %c0_19 = arith.constant 0 : index
    %c0_20 = arith.constant 0 : index
    %32 = vector.load %arg6[%c0_19, %c0_20] : memref<32x256xf32, #tpu.memory_space<vmem>>, vector<32x256xf32>
    %33 = arith.addf %31, %32 : vector<32x256xf32>
    %cst_21 = arith.constant 0.000000e+00 : f32
    %34 = vector.broadcast %cst_21 : f32 to vector<32x256xf32>
    %35 = arith.cmpf oge, %33, %34 : vector<32x256xf32>
    %cst_22 = arith.constant 2.000000e-01 : f32
    %36 = vector.broadcast %cst_22 : f32 to vector<32x256xf32>
    %37 = arith.mulf %36, %33 : vector<32x256xf32>
    %38 = arith.select %35, %33, %37 : vector<32x256xi1>, vector<32x256xf32>
    %cst_23 = arith.constant 1.41421354 : f32
    %39 = vector.broadcast %cst_23 : f32 to vector<32x256xf32>
    %40 = arith.mulf %38, %39 : vector<32x256xf32>
    %cst_24 = arith.constant -2.560000e+02 : f32
    %cst_25 = arith.constant 2.560000e+02 : f32
    %41 = vector.broadcast %cst_24 : f32 to vector<32x256xf32>
    %42 = arith.maximumf %41, %40 : vector<32x256xf32>
    %43 = vector.broadcast %cst_25 : f32 to vector<32x256xf32>
    %44 = arith.minimumf %43, %42 : vector<32x256xf32>
    %45 = arith.truncf %44 : vector<32x256xf32> to vector<32x256xbf16>
    %c0_26 = arith.constant 0 : index
    %c0_27 = arith.constant 0 : index
    %c0_28 = arith.constant 0 : index
    %46 = vector.load %arg7[%c0_26, %c0_27, %c0_28] : memref<1x6x32xbf16, #tpu.memory_space<vmem>>, vector<1x6x32xbf16>
    %47 = vector.shape_cast %46 : vector<1x6x32xbf16> to vector<6x32xbf16>
    %cst_29 = arith.constant dense<0.000000e+00> : vector<6x256xf32>
    %48 = tpu.matmul %47, %45, %cst_29 {dimension_numbers = #tpu.dot_dimension_numbers<[1], [0], [0], [1], [0, 0, 1, 1], [], []>} : vector<6x32xbf16>, vector<32x256xbf16>, vector<6x256xf32> -> vector<6x256xf32>
    %c0_30 = arith.constant 0 : index
    %c0_31 = arith.constant 0 : index
    %49 = vector.load %arg8[%c0_30, %c0_31] : memref<6x256xf32, #tpu.memory_space<vmem>>, vector<6x256xf32>
    %50 = arith.addf %48, %49 : vector<6x256xf32>
    %cst_32 = arith.constant -2.560000e+02 : f32
    %cst_33 = arith.constant 2.560000e+02 : f32
    %51 = vector.broadcast %cst_32 : f32 to vector<6x256xf32>
    %52 = arith.maximumf %51, %50 : vector<6x256xf32>
    %53 = vector.broadcast %cst_33 : f32 to vector<6x256xf32>
    %54 = arith.minimumf %53, %52 : vector<6x256xf32>
    %55 = arith.addf %54, %14 : vector<6x256xf32>
    %c0_34 = arith.constant 0 : index
    %c0_35 = arith.constant 0 : index
    %c0_36 = arith.constant 0 : index
    %56 = vector.load %arg9[%c0_34, %c0_35, %c0_36] : memref<1x6x256xf32, #tpu.memory_space<vmem>>, vector<1x6x256xf32>
    %57 = vector.shape_cast %56 : vector<1x6x256xf32> to vector<6x256xf32>
    %58 = vector.shape_cast %55 : vector<6x256xf32> to vector<1x6x256xf32>
    tpu.vector_store %arg9[%c0_34, %c0_35, %c0_36], %58 {strides = array<i32>} : memref<1x6x256xf32, #tpu.memory_space<vmem>>, vector<1x6x256xf32>,
    return
  }
  func.func @transform_0(%arg0: i32) -> (i32, i32, i32) {
    %c0_i32 = arith.constant 0 : i32
    %c0_i32_0 = arith.constant 0 : i32
    %c0_i32_1 = arith.constant 0 : i32
    return %arg0, %c0_i32, %c0_i32_0 : i32, i32, i32
  }
  func.func @transform_1(%arg0: i32) -> (i32, i32, i32) {
    %c0_i32 = arith.constant 0 : i32
    %c0_i32_0 = arith.constant 0 : i32
    %c0_i32_1 = arith.constant 0 : i32
    return %arg0, %c0_i32, %c0_i32_0 : i32, i32, i32
  }
  func.func @transform_2(%arg0: i32) -> (i32, i32) {
    %c0_i32 = arith.constant 0 : i32
    %c0_i32_0 = arith.constant 0 : i32
    %c0_i32_1 = arith.constant 0 : i32
    return %c0_i32, %c0_i32_0 : i32, i32
  }
  func.func @transform_3(%arg0: i32) -> (i32, i32) {
    %c0_i32 = arith.constant 0 : i32
    %c0_i32_0 = arith.constant 0 : i32
    %c0_i32_1 = arith.constant 0 : i32
    return %c0_i32, %c0_i32_0 : i32, i32
  }
  func.func @transform_4(%arg0: i32) -> (i32, i32, i32) {
    %c0_i32 = arith.constant 0 : i32
    %c0_i32_0 = arith.constant 0 : i32
    %c0_i32_1 = arith.constant 0 : i32
    return %arg0, %c0_i32, %c0_i32_0 : i32, i32, i32
  }
  func.func @transform_5(%arg0: i32) -> (i32, i32) {
    %c0_i32 = arith.constant 0 : i32
    %c0_i32_0 = arith.constant 0 : i32
    %c0_i32_1 = arith.constant 0 : i32
    return %c0_i32, %c0_i32_0 : i32, i32
  }
  func.func @transform_6(%arg0: i32) -> (i32, i32, i32) {
    %c0_i32 = arith.constant 0 : i32
    %c0_i32_0 = arith.constant 0 : i32
    %c0_i32_1 = arith.constant 0 : i32
    return %arg0, %c0_i32, %c0_i32_0 : i32, i32, i32
  }
  func.func @transform_7(%arg0: i32) -> (i32, i32) {
    %c0_i32 = arith.constant 0 : i32
    %c0_i32_0 = arith.constant 0 : i32
    %c0_i32_1 = arith.constant 0 : i32
    return %c0_i32, %c0_i32_0 : i32, i32
  }
  func.func @transform_8(%arg0: i32) -> (i32, i32, i32) {
    %c0_i32 = arith.constant 0 : i32
    %c0_i32_0 = arith.constant 0 : i32
    %c0_i32_1 = arith.constant 0 : i32
    return %arg0, %c0_i32, %c0_i32_0 : i32, i32, i32
  }
}

</mosaic_0001>

<bundles_post_ra>
// kernel: post_neural_renderer_forward_pallas.1
= control target key start
LH: loop header
LB: loop body
LE: loop exit
PB: predicated region body
PF: predicated region fallthrough
CT: control target
= control target key end

     0   :  { %vm50_vm0 = vcmask 1041408   ;;  %vm51_vm1 = vsmask.f32 1280  ;;  %vm91_vm2 = vcmask 523264   ;;  %v613_v25 = vmov 0   ;;  %s791_s0 = inlined_call_operand.vmem [shape: bf16[1,64,64], index: 0, kind: input, shape index: {}]   ;;  %s792_s1 = inlined_call_operand.vmem [shape: bf16[1,32,64], index: 1, kind: input, shape index: {}]   ;;  %s793_s2 = inlined_call_operand.vmem [shape: bf16[64,256], index: 2, kind: input, shape index: {}]   ;;  %s794_s4 = inlined_call_operand.vmem [shape: bf16[1,32,32], index: 4, kind: input, shape index: {}]   ;;  %s795_s3 = inlined_call_operand.vmem [shape: f32[32,256], index: 3, kind: input, shape index: {}]   ;;  %s796_s5 = inlined_call_operand.vmem [shape: f32[32,256], index: 5, kind: input, shape index: {}]   ;;  %s797_s6 = inlined_call_operand.vmem [shape: bf16[1,6,32], index: 6, kind: input, shape index: {}]   ;;  %s798_s7 = inlined_call_operand.vmem [shape: f32[6,256], index: 7, kind: input, shape index: {}]   ;;  %s799_s8 = inlined_call_operand.vmem [shape: f32[1,6,256], index: 8, kind: output, shape index: {}]  }
   0x1   :  { %v30_v0 = vld [vmem:[%s791_s0] sm:$0xf]  ;;  %v31_v1 = vld [vmem:[%s791_s0 + $0x4] sm:$0xf]  ;;  %v34_v2 = vld [vmem:[%s791_s0 + $0x10] sm:$0xf]  ;;  %239 = vmatprep.mubr.bf16.mxu1 %v613_v25 }
   0x2   :  { %v529_v3 = vcombine.low %v34_v2, %v34_v2  ;;  %v532_v4 = vcombine.low %v30_v0, %v31_v1  ;;  %v594_v5 = vld [vmem:[%s791_s0 + $0x8] sm:$0xff]   ;;  %v35_v6 = vld [vmem:[%s791_s0 + $0x14] sm:$0xf]  ;;  %v597_v9 = vld [vmem:[%s792_s1] sm:$0xff]   ;;  %vm358_vm12 = vcmask 261120  }
   0x3   :  { %vm52_vm3 = vmand %vm50_vm0, %vm51_vm1  ;;  %v534_v12 = vcombine.low %v34_v2, %v35_v6  ;;  %587 = vmatprep.mubr.msk.bf16.mxu0 %vm91_vm2, %v597_v9  ;;  %v599_v13 = vld [vmem:[%s793_s2 + $0x4] ss:$8 sps:$4 sm:$0xff]   ;;  %v601_v14 = vld [vmem:[%s793_s2] ss:$8 sps:$4 sm:$0xff]  }
   0x4   :  { %v42_v7 = vshrl.u32 %v529_v3, 16  ;;  %v45_v8 = vshll.u32 %v529_v3, 16  ;;  %579 = vmatprep.subr.bf16.mxu0 %v532_v4  ;;  %v602_v16 = vld [vmem:[%s793_s2 + $0x14] ss:$8 sps:$4 sm:$0xff]   ;;  %207 = vmatprep.subr.bf16.mxu1 %v599_v13  ;;  %v604_v19 = vld [vmem:[%s793_s2 + $0x10] ss:$8 sps:$4 sm:$0xff]  }
   0x5   :  { %580 = vmatpush3.bf16.msra.mxu0 %v532_v4  ;;  %v596_v18 = vld [vmem:[%s791_s0 + $0x18] sm:$0xff]   ;;  %208 = vmatpush1.bf16.msra.mxu1 %v601_v14  ;;  %v605_v20 = vld [vmem:[%s793_s2 + $0x24] ss:$8 sps:$4 sm:$0xff]   ;;  %v607_v21 = vld [vmem:[%s793_s2 + $0x20] ss:$8 sps:$4 sm:$0xff]  }
   0x6   :  { %v44_v10 = vrot.slane %v42_v7, 6  ;;  %v47_v11 = vrot.slane %v45_v8, 7  ;;  %581 = vmatprep.subr.bf16.mxu0 %v594_v5  ;;  %209 = vmatprep.subr.bf16.mxu1 %v602_v16  ;;  %v598_v22 = vld [vmem:[%s792_s1 + $0x8] sm:$0xff]   ;;  %v608_v23 = vld [vmem:[%s793_s2 + $0x34] ss:$8 sps:$4 sm:$0xff]   ;;  %v268_v33 = vld [vmem:[%s795_s3] sm:$0xff] }
   0x7   :  { %v610_v24 = vld [vmem:[%s793_s2 + $0x30] ss:$8 sps:$4 sm:$0xff]   ;;  %v269_v34 = vld [vmem:[%s795_s3 + $0x8] sm:$0xff]  ;;  %v272_v52 = vld [vmem:[%s795_s3 + $0x20] sm:$0xff] }
   0x8   :  { %v48_v15 = vor.u32 %v47_v11, %v44_v10  ;;  %v270_v36 = vld [vmem:[%s795_s3 + $0x10] sm:$0xff]  ;;  %v271_v39 = vld [vmem:[%s795_s3 + $0x18] sm:$0xff]  ;;  %v273_v55 = vld [vmem:[%s795_s3 + $0x28] sm:$0xff] }
   0x9   :  { %582 = vmatpush3.bf16.msra.mxu0 %v594_v5  ;;  %210 = vmatpush1.bf16.msra.mxu1 %v604_v19  ;;  %v274_v59 = vld [vmem:[%s795_s3 + $0x30] sm:$0xff]  ;;  %v275_v63 = vld [vmem:[%s795_s3 + $0x38] sm:$0xff] }
   0xa   :  { %v53_v17 = vsel %vm52_vm3, %v30_v0, %v48_v15  ;;  %583 = vmatprep.subr.bf16.mxu0 %v534_v12  ;;  %211 = vmatprep.subr.bf16.mxu1 %v605_v20 }
   0xb   :  { %v538_v32 = vcombine.low %v53_v17, %v53_v17 }
   0xd   :  { %584 = vmatpush3.bf16.msra.mxu0 %v534_v12  ;;  %212 = vmatpush1.bf16.msra.mxu1 %v607_v21 }
   0xe   :  { %585 = vmatprep.subr.bf16.mxu0 %v596_v18  ;;  %213 = vmatprep.subr.bf16.mxu1 %v608_v23 }
  0x11   :  { %586 = vmatpush3.bf16.msra.mxu0 %v596_v18  ;;  %214 = vmatpush1.bf16.msra.mxu1 %v610_v24 }
  0x14   :  { %588 = vmatmul.mubr.msk.bf16.vlgmr.msra.gmra.mrb[0].mxu0 %vm91_vm2, %v598_v22 }
  0x15   :  { %397 = vmatprep.mubr.bf16.mxu0 %v613_v25 }
  0xe7   :  { %v589_v26 = vpop.f32.mrb[0].mxu0 }
  0xe8   :  { %v132_v27 = vpop.f32.mrb[1].mxu0 }
  0xe9   :  { %v590_v28 = vpop.f32.mrb[2].mxu0 }
  0xea   :  { %v148_v29 = vpack.c.bf16 %v590_v28, %v589_v26  ;;  %v135_v30 = vpop.f32.mrb[3].mxu0 }
  0xeb   :  { %v147_v31 = vpack.c.bf16 %v135_v30, %v132_v27  ;;  %v611_v30 = vld [vmem:[%s794_s4] sm:$0xff]  }
  0xed   :  { %547 = vmatmul.mubr.msk.bf16.vlgmr.msra.gmra.mrb[0].mxu1 %vm91_vm2, %v147_v31  ;;  %v612_v31 = vld [vmem:[%s794_s4 + $0x8] sm:$0xff]  }
  0xee   :  { %249 = vmatprep.mubr.bf16.mxu1 %v613_v25 }
  0xf5   :  { %548 = vmatmul.mubr.msk.bf16.gmra.mrb[4].mxu1 %vm91_vm2, %v148_v29 }
  0xf6   :  { %259 = vmatprep.mubr.bf16.mxu1 %v613_v25 }
  0xfd   :  { %549 = vmatmul.mubr.msk.bf16.gmra.mrb[8].mxu1 %vm91_vm2, %v538_v32  ;;  %v340_v32 = vld [vmem:[%s796_s5] sm:$0xff] }
 0x1c0   :  { %v241_v35 = vpop.f32.mrb[0].mxu1 }
 0x1c1   :  { %v276_v37 = vadd.f32 %v268_v33, %v241_v35  ;;  %v243_v38 = vpop.f32.mrb[1].mxu1  ;;  %v341_v33 = vld [vmem:[%s796_s5 + $0x8] sm:$0xff]  ;;  %v342_v35 = vld [vmem:[%s796_s5 + $0x10] sm:$0xff] }
 0x1c2   :  { %v277_v40 = vadd.f32 %v269_v34, %v243_v38  ;;  %v245_v41 = vpop.f32.mrb[2].mxu1  ;;  %v343_v38 = vld [vmem:[%s796_s5 + $0x18] sm:$0xff] }
 0x1c3   :  { %vm284_vm4 = vcmp.ge.f32.partialorder %v276_v37, 0.0  ;;  %v292_v42 = vmul.f32 0.2, %v276_v37  ;;  %v278_v43 = vadd.f32 %v270_v36, %v245_v41  ;;  %v247_v44 = vpop.f32.mrb[3].mxu1 }
 0x1c4   :  { %vm285_vm5 = vcmp.ge.f32.partialorder %v277_v40, 0.0  ;;  %v293_v45 = vmul.f32 0.2, %v277_v40  ;;  %v279_v46 = vadd.f32 %v271_v39, %v247_v44 }
 0x1c5   :  { %v300_v47 = vsel %vm284_vm4, %v276_v37, %v292_v42  ;;  %vm286_vm6 = vcmp.ge.f32.partialorder %v278_v43, 0.0  ;;  %v294_v48 = vmul.f32 0.2, %v278_v43 }
 0x1c6   :  { %v308_v49 = vmul.f32 1.4142135, %v300_v47  ;;  %v301_v50 = vsel %vm285_vm5, %v277_v40, %v293_v45  ;;  %vm287_vm7 = vcmp.ge.f32.partialorder %v279_v46, 0.0  ;;  %v295_v51 = vmul.f32 0.2, %v279_v46 }
 0x1c7   :  { %v309_v53 = vmul.f32 1.4142135, %v301_v50  ;;  %v302_v54 = vsel %vm286_vm6, %v278_v43, %v294_v48  ;;  %v344_v50 = vld [vmem:[%s796_s5 + $0x20] sm:$0xff] }
 0x1c8   :  { %v310_v56 = vmul.f32 1.4142135, %v302_v54  ;;  %v303_v57 = vsel %vm287_vm7, %v279_v46, %v295_v51  ;;  %v251_v58 = vpop.f32.mrb[4].mxu1  ;;  %v550_v0 = vclamps-f32 %v308_v49, 256.0 }
 0x1c9   :  { %v311_v60 = vmul.f32 1.4142135, %v303_v57  ;;  %v280_v61 = vadd.f32 %v272_v52, %v251_v58  ;;  %v253_v62 = vpop.f32.mrb[5].mxu1  ;;  %v551_v1 = vclamps-f32 %v309_v53, 256.0  ;;  %v345_v53 = vld [vmem:[%s796_s5 + $0x28] sm:$0xff]  ;;  %v346_v57 = vld [vmem:[%s796_s5 + $0x30] sm:$0xff] }
 0x1ca   :  { %v552_v2 = vclamps-f32 %v310_v56, 256.0  ;;  %v281_v3 = vadd.f32 %v273_v55, %v253_v62  ;;  %v255_v4 = vpop.f32.mrb[6].mxu1 }
 0x1cb   :  { %v553_v5 = vclamps-f32 %v311_v60, 256.0  ;;  %vm288_vm8 = vcmp.ge.f32.partialorder %v280_v61, 0.0  ;;  %v296_v6 = vmul.f32 0.2, %v280_v61  ;;  %v282_v7 = vadd.f32 %v274_v59, %v255_v4  ;;  %v257_v8 = vpop.f32.mrb[7].mxu1 }
 0x1cc   :  { %vm289_vm9 = vcmp.ge.f32.partialorder %v281_v3, 0.0  ;;  %v297_v9 = vmul.f32 0.2, %v281_v3  ;;  %v283_v10 = vadd.f32 %v275_v63, %v257_v8  ;;  %v336_v11 = vpack.c.bf16 %v552_v2, %v550_v0 }
 0x1cd   :  { %v304_v12 = vsel %vm288_vm8, %v280_v61, %v296_v6  ;;  %vm290_vm10 = vcmp.ge.f32.partialorder %v282_v7, 0.0  ;;  %v298_v13 = vmul.f32 0.2, %v282_v7  ;;  %v337_v14 = vpack.c.bf16 %v553_v5, %v551_v1  ;;  %v347_v61 = vld [vmem:[%s796_s5 + $0x38] sm:$0xff] }
 0x1ce   :  { %v312_v15 = vmul.f32 1.4142135, %v304_v12  ;;  %v305_v16 = vsel %vm289_vm9, %v281_v3, %v297_v9  ;;  %vm291_vm11 = vcmp.ge.f32.partialorder %v283_v10, 0.0  ;;  %v299_v17 = vmul.f32 0.2, %v283_v10 }
 0x1cf   :  { %v313_v18 = vmul.f32 1.4142135, %v305_v16  ;;  %v306_v19 = vsel %vm290_vm10, %v282_v7, %v298_v13  ;;  %365 = vmatprep.subr.bf16.mxu0 %v337_v14 }
 0x1d0   :  { %v314_v20 = vmul.f32 1.4142135, %v306_v19  ;;  %v307_v21 = vsel %vm291_vm11, %v283_v10, %v299_v17  ;;  %366 = vmatpush1.bf16.msra.mxu0 %v336_v11  ;;  %v554_v23 = vclamps-f32 %v312_v15, 256.0 }
 0x1d1   :  { %v315_v22 = vmul.f32 1.4142135, %v307_v21  ;;  %v555_v26 = vclamps-f32 %v313_v18, 256.0 }
 0x1d2   :  { %v556_v24 = vclamps-f32 %v314_v20, 256.0 }
 0x1d3   :  { %v557_v27 = vclamps-f32 %v315_v22, 256.0 }
 0x1d4   :  { %v338_v28 = vpack.c.bf16 %v556_v24, %v554_v23 }
 0x1d5   :  { %v339_v29 = vpack.c.bf16 %v557_v27, %v555_v26 }
 0x1d7   :  { %367 = vmatprep.subr.bf16.mxu0 %v339_v29  ;;  %v261_v29 = vpop.f32.mrb[8].mxu1 }
 0x1d8   :  { %368 = vmatpush1.bf16.msra.mxu0 %v338_v28  ;;  %v470_v28 = vld [vmem:[%s797_s6] sm:$0x7] }
 0x1db   :  { %560 = vmatmul.mubr.msk.bf16.vlgmr.msra.gmra.mrb[4].mxu0 %vm358_vm12, %v611_v30  ;;  %v263_v30 = vpop.f32.mrb[9].mxu1 }
 0x1dc   :  { %407 = vmatprep.mubr.bf16.mxu0 %v613_v25 }
 0x1e3   :  { %561 = vmatmul.mubr.msk.bf16.gmra.mrb[8].mxu0 %vm358_vm12, %v612_v31  ;;  %v265_v31 = vpop.f32.mrb[10].mxu1 }
 0x1e4   :  { %508 = vmatprep.mubr.bf16.mxu0 %v613_v25 }
 0x2ae   :  { %v399_v34 = vpop.f32.mrb[4].mxu0 }
 0x2af   :  { %v400_v36 = vadd.f32 %v399_v34, %v340_v32  ;;  %v401_v37 = vpop.f32.mrb[5].mxu0  ;;  %v266_v32 = vpop.f32.mrb[11].mxu1  ;;  %v472_v34 = vld [vmem:[%s798_s7 + $0x8] sm:$0x3f] }
 0x2b0   :  { %v402_v25 = vadd.f32 %v401_v37, %v341_v33  ;;  %v403_v39 = vpop.f32.mrb[6].mxu0  ;;  %v471_v33 = vld [vmem:[%s798_s7] sm:$0x3f] }
 0x2b1   :  { %vm418_vm13 = vcmp.ge.f32.partialorder %v400_v36, 0.0  ;;  %v426_v40 = vmul.f32 0.2, %v400_v36  ;;  %v404_v41 = vadd.f32 %v403_v39, %v342_v35  ;;  %v405_v42 = vpop.f32.mrb[7].mxu0 }
 0x2b2   :  { %vm419_vm14 = vcmp.ge.f32.partialorder %v402_v25, 0.0  ;;  %v427_v43 = vmul.f32 0.2, %v402_v25  ;;  %v406_v44 = vadd.f32 %v405_v42, %v343_v38 }
 0x2b3   :  { %v434_v45 = vsel %vm418_vm13, %v400_v36, %v426_v40  ;;  %vm420_vm15 = vcmp.ge.f32.partialorder %v404_v41, 0.0  ;;  %v428_v46 = vmul.f32 0.2, %v404_v41 }
 0x2b4   :  { %v442_v47 = vmul.f32 1.4142135, %v434_v45  ;;  %v435_v48 = vsel %vm419_vm14, %v402_v25, %v427_v43  ;;  %vm421_vm0 = vcmp.ge.f32.partialorder %v406_v44, 0.0  ;;  %v429_v49 = vmul.f32 0.2, %v406_v44 }
 0x2b5   :  { %v443_v51 = vmul.f32 1.4142135, %v435_v48  ;;  %v436_v52 = vsel %vm420_vm15, %v404_v41, %v428_v46 }
 0x2b6   :  { %v444_v54 = vmul.f32 1.4142135, %v436_v52  ;;  %v437_v55 = vsel %vm421_vm0, %v406_v44, %v429_v49  ;;  %v409_v56 = vpop.f32.mrb[8].mxu0  ;;  %v562_v62 = vclamps-f32 %v442_v47, 256.0 }
 0x2b7   :  { %v445_v58 = vmul.f32 1.4142135, %v437_v55  ;;  %v410_v59 = vadd.f32 %v409_v56, %v344_v50  ;;  %v411_v60 = vpop.f32.mrb[9].mxu0  ;;  %v563_v63 = vclamps-f32 %v443_v51, 256.0 }
 0x2b8   :  { %v564_v0 = vclamps-f32 %v444_v54, 256.0  ;;  %v412_v1 = vadd.f32 %v411_v60, %v345_v53  ;;  %v413_v2 = vpop.f32.mrb[10].mxu0 }
 0x2b9   :  { %v565_v3 = vclamps-f32 %v445_v58, 256.0  ;;  %vm422_vm1 = vcmp.ge.f32.partialorder %v410_v59, 0.0  ;;  %v430_v4 = vmul.f32 0.2, %v410_v59  ;;  %v414_v5 = vadd.f32 %v413_v2, %v346_v57  ;;  %v415_v6 = vpop.f32.mrb[11].mxu0 }
 0x2ba   :  { %vm423_vm2 = vcmp.ge.f32.partialorder %v412_v1, 0.0  ;;  %v431_v7 = vmul.f32 0.2, %v412_v1  ;;  %v416_v8 = vadd.f32 %v415_v6, %v347_v61  ;;  %v466_v9 = vpack.c.bf16 %v564_v0, %v562_v62 }
 0x2bb   :  { %v438_v10 = vsel %vm422_vm1, %v410_v59, %v430_v4  ;;  %vm424_vm3 = vcmp.ge.f32.partialorder %v414_v5, 0.0  ;;  %v432_v11 = vmul.f32 0.2, %v414_v5  ;;  %v467_v12 = vpack.c.bf16 %v565_v3, %v563_v63 }
 0x2bc   :  { %v446_v13 = vmul.f32 1.4142135, %v438_v10  ;;  %v439_v14 = vsel %vm423_vm2, %v412_v1, %v431_v7  ;;  %vm425_vm4 = vcmp.ge.f32.partialorder %v416_v8, 0.0  ;;  %v433_v15 = vmul.f32 0.2, %v416_v8 }
 0x2bd   :  { %v447_v16 = vmul.f32 1.4142135, %v439_v14  ;;  %v440_v17 = vsel %vm424_vm3, %v414_v5, %v432_v11  ;;  %476 = vmatprep.subr.bf16.mxu0 %v467_v12 }
 0x2be   :  { %v448_v18 = vmul.f32 1.4142135, %v440_v17  ;;  %v441_v19 = vsel %vm425_vm4, %v416_v8, %v433_v15  ;;  %477 = vmatpush1.bf16.msra.mxu0 %v466_v9  ;;  %v566_v21 = vclamps-f32 %v446_v13, 256.0 }
 0x2bf   :  { %v449_v20 = vmul.f32 1.4142135, %v441_v19  ;;  %v567_v23 = vclamps-f32 %v447_v16, 256.0 }
 0x2c0   :  { %v568_v22 = vclamps-f32 %v448_v18, 256.0 }
 0x2c1   :  { %v569_v24 = vclamps-f32 %v449_v20, 256.0 }
 0x2c2   :  { %v468_v26 = vpack.c.bf16 %v568_v22, %v566_v21 }
 0x2c3   :  { %v469_v27 = vpack.c.bf16 %v569_v24, %v567_v23 }
 0x2c5   :  { %478 = vmatprep.subr.bf16.mxu0 %v469_v27 }
 0x2c6   :  { %479 = vmatpush1.bf16.msra.mxu0 %v468_v26 }
 0x2c9   :  { %570 = vmatmul.mubr.msk.bf16.vlgmr.msra.gmra.mrb[12].mxu0 %vm358_vm12, %v470_v28 }
 0x39c   :  { %v510_v35 = vpop.f32.mrb[12].mxu0 }
 0x39d   :  { %v511_v36 = vadd.f32 %v510_v35, %v471_v33  ;;  %v512_v37 = vpop.f32.mrb[13].mxu0 }
 0x39e   :  { %v513_v38 = vadd.f32 %v512_v37, %v472_v34  ;;  %v514_v25 = vpop.f32.mrb[14].mxu0 }
 0x39f   :  { %v571_v39 = vclamps-f32 %v511_v36, 256.0  ;;  %v515_v40 = vpop.f32.mrb[15].mxu0 }
 0x3a0   :  { %v572_v41 = vclamps-f32 %v513_v38, 256.0 }
 0x3a1   :  { %v521_v42 = vadd.f32 %v571_v39, %v261_v29 }
 0x3a2   :  { %v522_v43 = vadd.f32 %v572_v41, %v263_v30 }
 0x3a3   :  { %523 = vst [vmem:[%s799_s8] sm:$0x3f] %v521_v42 }
 0x3a4   :  { %524 = vst [vmem:[%s799_s8 + $0x8] sm:$0x3f] %v522_v43 }

</bundles_post_ra>
